<compile_context>
chip_gen: v7x
topology: tpu7x:2x2x1
jax: 0.10.0
libtpu: 0.0.40
codegen_flags: <defaults>
</compile_context>

<pallas_src>
import jax
import jax.numpy as jnp
from jax.experimental import pallas as pl
from jax.experimental.pallas import tpu as pltpu


def _upconv_kernel(x_ref, w_ref, o_ref):
    """Fused unpool(x2) + crop + 3x3/pad-1 conv (no bias) for a block of images.

    x_ref : (B, Hc+1, (Wc+1)*Cin)  lane-fused compact input; the zero halo
                                   (bottom row, right W-position) was padded by
                                   the wrapper.
    w_ref : (2, (Wc+1)*Cin, 2*S)   block-banded weights; slab 0 multiplies x
                                   rows p, slab 1 multiplies x rows p+1.
                                   S = 2*Wc*Cout.
    o_ref : (2, B, Hc, S)          output split by output-row parity,
                                   lane-dense as (2q+cp)*Cout + co.
    """
    B, Hp, Wp = x_ref.shape
    Hc = Hp - 1
    S = o_ref.shape[-1]

    # The two row slabs feed the MXU directly in their lane-fused layout:
    # no halo concatenate, no im2col, no parity interleave in-kernel.
    top = x_ref[:, pl.ds(0, Hc), :].reshape(B * Hc, Wp)   # x[p,   :]
    bot = x_ref[:, pl.ds(1, Hc), :].reshape(B * Hc, Wp)   # x[p+1, :]

    acc = jnp.dot(top, w_ref[0], preferred_element_type=jnp.float32)
    acc = acc + jnp.dot(bot, w_ref[1], preferred_element_type=jnp.float32)

    # Column halves of acc are the two output-row parities; columns within a
    # half are already ordered (2q+cp)*Cout + co, so the stores are lane-dense.
    o_ref[0] = acc[:, :S].reshape(B, Hc, S).astype(o_ref.dtype)   # rows 2p
    o_ref[1] = acc[:, S:].reshape(B, Hc, S).astype(o_ref.dtype)   # rows 2p+1


def _pack_weight(conv1_w_oihw, Wc, dtype):
    """(Cout, Cin, 3, 3) OIHW -> (2, (Wc+1)*Cin, 2*2*Wc*Cout) block-banded weight.

    A 3x3 conv over the stride-2 zero-stuffed input only ever reads the
    original x at 4 taps.  With row/col output parities (rp, cp):
      kh=0 -> (rp=1, x row p),  kh=1 -> (rp=0, x row p),  kh=2 -> (rp=1, x row p+1)
      kw=0 -> (cp=1, x col q),  kw=1 -> (cp=0, x col q),  kw=2 -> (cp=1, x col q+1)
    Rows of each slab are (w_pos*Cin + ci) matching the lane-fused input;
    columns are (rp*2*Wc*Cout + (2q+cp)*Cout + co) matching the output layout.
    Structural zeros elsewhere (banded / block-sparse).
    """
    cout, cin = conv1_w_oihw.shape[0], conv1_w_oihw.shape[1]
    w = jnp.transpose(conv1_w_oihw, (2, 3, 1, 0)).astype(jnp.float32)  # HWIO (3,3,Cin,Cout)

    q = jnp.arange(Wc)

    def sel(delta, cp):                               # (Wc+1, 2*Wc) band selector
        s = jnp.zeros((Wc + 1, 2 * Wc), jnp.float32)
        return s.at[q + delta, 2 * q + cp].set(1.0)

    kh_map = {0: (1, 0), 1: (0, 0), 2: (1, 1)}        # kh -> (rp, slab)
    kw_map = {0: (1, 0), 1: (0, 0), 2: (1, 1)}        # kw -> (cp, delta)

    big = jnp.zeros((2, Wc + 1, cin, 2, 2 * Wc, cout), jnp.float32)
    for kh in range(3):
        rp, slab = kh_map[kh]
        for kw in range(3):
            cp, delta = kw_map[kw]
            contrib = jnp.einsum('ws,io->wiso', sel(delta, cp), w[kh, kw])
            big = big.at[slab, :, :, rp, :, :].add(contrib)
    return big.reshape(2, (Wc + 1) * cin, 2 * 2 * Wc * cout).astype(dtype)


def _pick_images_per_block(n_images, per_image_bytes, budget_bytes=16 * 1024 * 1024):
    """Largest divisor of n_images fitting the VMEM budget, while keeping the
    grid >= 2 steps whenever n_images >= 2 (so both v7x TensorCores get work)."""
    best = 1
    for b in range(1, n_images + 1):
        if n_images % b != 0:
            continue
        if n_images >= 2 and (n_images // b) < 2:
            continue
        if b * per_image_bytes > budget_bytes:
            continue
        best = b
    return best


def simple_gudi_upconv_block_last_layer(x_nchw, conv1_w_oihw, oheight=0,
                                        owidth=0, compute_dtype=jnp.bfloat16):
    """Forward pass matching the PyTorch module (NCHW in / NCHW out)."""
    N, Cin, H, W = x_nchw.shape
    Cout = conv1_w_oihw.shape[0]

    crop = (oheight != 0) and (owidth != 0)
    oH = int(oheight) if crop else 2 * H
    oW = int(owidth) if crop else 2 * W
    # Only x[i, j] with 2i < oH and 2j < oW can reach the cropped output
    # (crop-before-conv == drop those x rows/cols; the zero halo provides the pad).
    Hc = min(H, (oH + 1) // 2)
    Wc = min(W, (oW + 1) // 2)

    Wp = (Wc + 1) * Cin             # lane width of the padded, lane-fused input
    S = 2 * Wc * Cout               # lane width of one output-row-parity slab

    # Wrapper-side input plumbing (one fused XLA pass over x): crop,
    # NCHW->NHWC, cast to the MXU dtype, lane-fuse (W, Cin), zero halo.
    xi = x_nchw[:, :, :Hc, :Wc]
    xi = jnp.transpose(xi, (0, 2, 3, 1)).astype(compute_dtype)
    xi = xi.reshape(N, Hc, Wc * Cin)
    xi = jnp.pad(xi, ((0, 0), (0, 1), (0, Cin)))      # bottom row + right col zeros

    w_packed = _pack_weight(conv1_w_oihw, Wc, compute_dtype)     # (2, Wp, 2*S)

    out_dtype = x_nchw.dtype
    per_image_bytes = (
        2 * (Hc + 1) * Wp * jnp.dtype(compute_dtype).itemsize    # input  (double-buffered)
        + 2 * 2 * Hc * S * jnp.dtype(out_dtype).itemsize         # output (double-buffered)
        + 3 * Hc * 2 * S * 4)                                    # f32 acc + intermediates
    B = _pick_images_per_block(N, per_image_bytes)
    grid = (N // B,)

    flops = int(2 * N * Hc * Wc * 9 * Cin * Cout)     # useful MACs (9 taps per x pixel)
    bytes_accessed = int(xi.size * xi.dtype.itemsize
                         + w_packed.size * w_packed.dtype.itemsize
                         + 2 * N * Hc * S * jnp.dtype(out_dtype).itemsize)

    out = pl.pallas_call(
        _upconv_kernel,
        out_shape=jax.ShapeDtypeStruct((2, N, Hc, S), out_dtype),
        grid=grid,
        in_specs=[
            pl.BlockSpec((B, Hc + 1, Wp), lambda n: (n, 0, 0)),
            pl.BlockSpec((2, Wp, 2 * S), lambda n: (0, 0, 0)),
        ],
        out_specs=pl.BlockSpec((2, B, Hc, S), lambda n: (0, n, 0, 0)),
        compiler_params=pltpu.CompilerParams(
            dimension_semantics=("parallel",),
            vmem_limit_bytes=48 * 1024 * 1024),
        cost_estimate=pl.CostEstimate(flops=flops, transcendentals=0,
                                      bytes_accessed=bytes_accessed),
    )(xi, w_packed)

    # Parity interleave + NHWC->NCHW folded into the wrapper's single
    # reshape/transpose pass; then crop (narrow) to (oH, oW).
    out = out.reshape(2, N, Hc, 2 * Wc, Cout)
    out = jnp.transpose(out, (1, 4, 2, 0, 3))          # (N, Cout, Hc, 2, 2*Wc)
    out = out.reshape(N, Cout, 2 * Hc, 2 * Wc)
    return out[:, :, :oH, :oW]


def _reference_forward(x_nchw, conv1_w_oihw, oheight, owidth):
    """Pure-JAX mirror of the PyTorch forward (NCHW)."""
    N, C, H, W = x_nchw.shape
    up = jnp.zeros((N, C, 2 * H, 2 * W), x_nchw.dtype)
    up = up.at[:, :, ::2, ::2].set(x_nchw)
    if oheight != 0 and owidth != 0:
        up = up[:, :, :oheight, :owidth]
    return jax.lax.conv_general_dilated(
        up, conv1_w_oihw, window_strides=(1, 1),
        padding=((1, 1), (1, 1)),
        dimension_numbers=("NCHW", "OIHW", "NCHW"))


if __name__ == "__main__":
    key = jax.random.PRNGKey(0)
    kx, kw = jax.random.split(key)

    N, in_channels, H, W = 2, 4, 16, 16
    out_channels = 8

    x = jax.random.normal(kx, (N, in_channels, H, W), dtype=jnp.float32)
    conv1_w = 0.1 * jax.random.normal(
        kw, (out_channels, in_channels, 3, 3), dtype=jnp.float32)

    fwd = jax.jit(simple_gudi_upconv_block_last_layer,
                  static_argnames=("oheight", "owidth", "compute_dtype"))

    # 1) f32 compute path, no crop: exact algorithm check.
    out = jax.block_until_ready(fwd(x, conv1_w, oheight=0, owidth=0,
                                    compute_dtype=jnp.float32))
    ref = _reference_forward(x, conv1_w, 0, 0)
    assert out.shape == (N, out_channels, 2 * H, 2 * W), out.shape
    assert jnp.allclose(out, ref, atol=1e-4, rtol=1e-4), (
        float(jnp.max(jnp.abs(out - ref))))

    # 2) f32, odd crop (32 -> 31x31).
    out = jax.block_until_ready(fwd(x, conv1_w, oheight=31, owidth=31,
                                    compute_dtype=jnp.float32))
    ref = _reference_forward(x, conv1_w, 31, 31)
    assert out.shape == (N, out_channels, 31, 31), out.shape
    assert jnp.allclose(out, ref, atol=1e-4, rtol=1e-4), (
        float(jnp.max(jnp.abs(out - ref))))

    # 3) f32, even crop (32 -> 30x16): exercises the "crop drops real x
    #    rows/cols before the conv" semantics.
    out = jax.block_until_ready(fwd(x, conv1_w, oheight=30, owidth=16,
                                    compute_dtype=jnp.float32))
    ref = _reference_forward(x, conv1_w, 30, 16)
    assert out.shape == (N, out_channels, 30, 16), out.shape
    assert jnp.allclose(out, ref, atol=1e-4, rtol=1e-4), (
        float(jnp.max(jnp.abs(out - ref))))

    # 4) default bf16 MXU path (performance configuration), loose tolerance.
    out = jax.block_until_ready(fwd(x, conv1_w, oheight=31, owidth=31,
                                    compute_dtype=jnp.bfloat16))
    ref = _reference_forward(x, conv1_w, 31, 31)
    assert out.shape == (N, out_channels, 31, 31), out.shape
    assert jnp.allclose(out, ref, atol=8e-2, rtol=8e-2), (
        float(jnp.max(jnp.abs(out - ref))))

    print("KERNEL_OK")
</pallas_src>

<mosaic_0001>
module attributes {stable_mosaic.version = 11 : i64} {
  func.func @_upconv_kernel(%arg0: i32, %arg1: memref<1x17x68xf32, #tpu.memory_space<vmem>>, %arg2: memref<2x68x512xf32, #tpu.memory_space<vmem>>, %arg3: memref<2x1x16x256xf32, #tpu.memory_space<vmem>>) attributes {dimension_semantics = [#tpu.dimension_semantics<parallel>], iteration_bounds = array<i64: 2>, scalar_prefetch = 0 : i64, scratch_operands = 0 : i64, tpu.core_type = #tpu.core_type<tc>, window_params = [{transform_indices = @transform_0, window_bounds = array<i64: 1, 17, 68>}, {pipeline_mode = #tpu.pipeline_mode<synchronous>, transform_indices = @transform_1, window_bounds = array<i64: 2, 68, 512>}, {transform_indices = @transform_2, window_bounds = array<i64: 2, 1, 16, 256>}]} {
    %c0 = arith.constant 0 : index
    %c0_0 = arith.constant 0 : index
    %c0_1 = arith.constant 0 : index
    %0 = vector.load %arg1[%c0, %c0_0, %c0_1] : memref<1x17x68xf32, #tpu.memory_space<vmem>>, vector<1x16x68xf32>
    %1 = vector.shape_cast %0 : vector<1x16x68xf32> to vector<16x68xf32>
    %c0_2 = arith.constant 0 : index
    %c1 = arith.constant 1 : index
    %c0_3 = arith.constant 0 : index
    %2 = vector.load %arg1[%c0_2, %c1, %c0_3] : memref<1x17x68xf32, #tpu.memory_space<vmem>>, vector<1x16x68xf32>
    %3 = vector.shape_cast %2 : vector<1x16x68xf32> to vector<16x68xf32>
    %c0_4 = arith.constant 0 : index
    %c0_5 = arith.constant 0 : index
    %c0_6 = arith.constant 0 : index
    %4 = vector.load %arg2[%c0_4, %c0_5, %c0_6] : memref<2x68x512xf32, #tpu.memory_space<vmem>>, vector<1x68x512xf32>
    %5 = vector.shape_cast %4 : vector<1x68x512xf32> to vector<68x512xf32>
    %cst = arith.constant dense<0.000000e+00> : vector<16x512xf32>
    %6 = tpu.matmul %1, %5, %cst {dimension_numbers = #tpu.dot_dimension_numbers<[1], [0], [0], [1], [0, 0, 1, 1], [], []>} : vector<16x68xf32>, vector<68x512xf32>, vector<16x512xf32> -> vector<16x512xf32>
    %c1_7 = arith.constant 1 : index
    %c0_8 = arith.constant 0 : index
    %c0_9 = arith.constant 0 : index
    %7 = vector.load %arg2[%c1_7, %c0_8, %c0_9] : memref<2x68x512xf32, #tpu.memory_space<vmem>>, vector<1x68x512xf32>
    %8 = vector.shape_cast %7 : vector<1x68x512xf32> to vector<68x512xf32>
    %cst_10 = arith.constant dense<0.000000e+00> : vector<16x512xf32>
    %9 = tpu.matmul %3, %8, %cst_10 {dimension_numbers = #tpu.dot_dimension_numbers<[1], [0], [0], [1], [0, 0, 1, 1], [], []>} : vector<16x68xf32>, vector<68x512xf32>, vector<16x512xf32> -> vector<16x512xf32>
    %10 = arith.addf %6, %9 : vector<16x512xf32>
    %11 = vector.extract_strided_slice %10 {offsets = [0, 0], sizes = [16, 256], strides = [1, 1]} : vector<16x512xf32> to vector<16x256xf32>
    %12 = vector.shape_cast %11 : vector<16x256xf32> to vector<1x16x256xf32>
    %c0_11 = arith.constant 0 : index
    %c0_12 = arith.constant 0 : index
    %c0_13 = arith.constant 0 : index
    %c0_14 = arith.constant 0 : index
    %13 = vector.load %arg3[%c0_11, %c0_12, %c0_13, %c0_14] : memref<2x1x16x256xf32, #tpu.memory_space<vmem>>, vector<1x1x16x256xf32>
    %14 = vector.shape_cast %13 : vector<1x1x16x256xf32> to vector<1x16x256xf32>
    %15 = vector.shape_cast %12 : vector<1x16x256xf32> to vector<1x1x16x256xf32>
    tpu.vector_store %arg3[%c0_11, %c0_12, %c0_13, %c0_14], %15 {strides = array<i32>} : memref<2x1x16x256xf32, #tpu.memory_space<vmem>>, vector<1x1x16x256xf32>,
    %16 = vector.extract_strided_slice %10 {offsets = [0, 256], sizes = [16, 256], strides = [1, 1]} : vector<16x512xf32> to vector<16x256xf32>
    %17 = vector.shape_cast %16 : vector<16x256xf32> to vector<1x16x256xf32>
    %c1_15 = arith.constant 1 : index
    %c0_16 = arith.constant 0 : index
    %c0_17 = arith.constant 0 : index
    %c0_18 = arith.constant 0 : index
    %18 = vector.load %arg3[%c1_15, %c0_16, %c0_17, %c0_18] : memref<2x1x16x256xf32, #tpu.memory_space<vmem>>, vector<1x1x16x256xf32>
    %19 = vector.shape_cast %18 : vector<1x1x16x256xf32> to vector<1x16x256xf32>
    %20 = vector.shape_cast %17 : vector<1x16x256xf32> to vector<1x1x16x256xf32>
    tpu.vector_store %arg3[%c1_15, %c0_16, %c0_17, %c0_18], %20 {strides = array<i32>} : memref<2x1x16x256xf32, #tpu.memory_space<vmem>>, vector<1x1x16x256xf32>,
    return
  }
  func.func @transform_0(%arg0: i32) -> (i32, i32, i32) {
    %c0_i32 = arith.constant 0 : i32
    %c0_i32_0 = arith.constant 0 : i32
    %c0_i32_1 = arith.constant 0 : i32
    return %arg0, %c0_i32, %c0_i32_0 : i32, i32, i32
  }
  func.func @transform_1(%arg0: i32) -> (i32, i32, i32) {
    %c0_i32 = arith.constant 0 : i32
    %c0_i32_0 = arith.constant 0 : i32
    %c0_i32_1 = arith.constant 0 : i32
    %c0_i32_2 = arith.constant 0 : i32
    return %c0_i32, %c0_i32_0, %c0_i32_1 : i32, i32, i32
  }
  func.func @transform_2(%arg0: i32) -> (i32, i32, i32, i32) {
    %c0_i32 = arith.constant 0 : i32
    %c0_i32_0 = arith.constant 0 : i32
    %c0_i32_1 = arith.constant 0 : i32
    %c0_i32_2 = arith.constant 0 : i32
    return %c0_i32, %arg0, %c0_i32_0, %c0_i32_1 : i32, i32, i32, i32
  }
}

</mosaic_0001>

<bundles_post_ra>
// kernel: simple_gudi_upconv_block_last_layer.1
= control target key start
LH: loop header
LB: loop body
LE: loop exit
PB: predicated region body
PF: predicated region fallthrough
CT: control target
= control target key end

     0   :  { %s868_s9 = smov 0   ;;  %s870_s10 = smov 0   ;;  %s1188_s0 = inlined_call_operand.vmem [shape: f32[2,17,68], index: 0, kind: input, shape index: {}]   ;;  %s1189_s1 = inlined_call_operand.vmem [shape: f32[2,68,512], index: 1, kind: input, shape index: {}]   ;;  %s1190_s2 = inlined_call_operand.vmem [shape: f32[2,2,16,256], index: 2, kind: output, shape index: {}]  }
   0x1   :  { %s872_s11 = smov 0  }
   0x2 LB: > { %s881_s12 = sadd.s32 4294967295, %s850_s11   ;;  %s883_s13 = sadd.s32 1, %s850_s11   ;;  %s850_s11 = sphi %s872_s11, %s1194_s11   ;;  %s846_s10 = sphi %s870_s10, %s1193_s10   ;;  %s842_s9 = sphi %s868_s9, %s1192_s9  }
   0x3   : > { %s63_s14 = ssub.s32 %s850_s11, %s883_s13  ;;  %s66_s15 = sadd.s32 1, %s846_s10 }
   0x4   : > { %p64_p0 = scmp.eq.s32.totalorder %s63_s14, 0  ;;  %p76_p1 = scmp.ne.s32.totalorder %s846_s10, %s842_s9 }
   0x5   : > { %p77_p2 = scmp.eq.s32.totalorder %s881_s12, 1  ;;  %p665_p3 = scmp.ge.s32.totalorder %s850_s11, 1 }
   0x6   : > { %s891_s16 = scalar_select %p64_p0, %s846_s10, %s66_s15  }
   0x7   : > { %p893_p4 = por %p77_p2, %p76_p1  ;;  %p112_p5 = scmp.lt.s32.totalorder %s850_s11, 3 }
   0x9   : > { %p113_p6 = pnand %p665_p3, %p112_p5 }
   0xa   : > { %v669_v0 = vld [vmem:[%s1189_s1 + $0x128] sm:$0xff] (!%p113_p6)  ;;  %v671_v2 = vld [vmem:[%s1189_s1 + $0x138] sm:$0xff] (!%p113_p6)  ;;  %v668_v5 = vld [vmem:[%s1189_s1 + $0x120] sm:$0xff] (!%p113_p6)  ;;  %v852_v7 = vmov (!%p113_p6), 0.0   ;;  %p133_p7 = scmp.lt.s32.totalorder (!%p113_p6), %s881_s12, 1  ;;  %vm222_vm0 = vcmask (!%p113_p6), 1043456  }
   0xb   : > { %116 = sbr.rel (%p113_p6) target bundleno = 278 (0x116), region = 28  ;;  %v673_v1 = vld [vmem:[%s1189_s1 + $0x148] sm:$0xff] (!%p113_p6)  ;;  %v675_v4 = vld [vmem:[%s1189_s1 + $0x158] sm:$0xff] (!%p113_p6)  ;;  %v672_v6 = vld [vmem:[%s1189_s1 + $0x140] sm:$0xff] (!%p113_p6)  ;;  %299 = vmatprep.mubr.f32.mxu0 (!%p113_p6), %v852_v7  ;;  %376 = vmatprep.mubr.f32.mxu1 (!%p113_p6), %v852_v7  ;;  %vm215_vm1 = vcmask (!%p113_p6), 556032   ;;  %s130_s14 = sand.u32 (!%p113_p6), 1, %s842_s9  }
   0xc   : > { %v730_v3 = vpack.c.bf16 (!%p113_p6), %v673_v1, %v669_v0  ;;  %v746_v8 = vpack.c.bf16 (!%p113_p6), %v675_v4, %v671_v2  ;;  %v732_v9 = vpack.c.bf16 (!%p113_p6), %v672_v6, %v668_v5  ;;  %v670_v10 = vld [vmem:[%s1189_s1 + $0x130] sm:$0xff] (!%p113_p6)  ;;  %v677_v12 = vld [vmem:[%s1189_s1 + $0x168] sm:$0xff] (!%p113_p6)  ;;  %v679_v15 = vld [vmem:[%s1189_s1 + $0x178] sm:$0xff] (!%p113_p6)  ;;  %s666_s18 = sshll.u32 (!%p113_p6), %s130_s14, 6 }
   0xd   : > { %v674_v11 = vld [vmem:[%s1189_s1 + $0x150] sm:$0xff] (!%p113_p6)  ;;  %v681_v14 = vld [vmem:[%s1189_s1 + $0x188] sm:$0xff] (!%p113_p6)  ;;  %v683_v16 = vld [vmem:[%s1189_s1 + $0x198] sm:$0xff] (!%p113_p6)  ;;  %s1154_s19 = scalar_lea.vmem (!%p113_p6), [#allocation2], %s666_s18 }
   0xe   : > { %731 = vmatprep.subr.bf16.mxu0 (!%p113_p6), %v730_v3  ;;  %v748_v13 = vpack.c.bf16 (!%p113_p6), %v674_v11, %v670_v10  ;;  %747 = vmatprep.subr.bf16.mxu1 (!%p113_p6), %v746_v8  ;;  %v734_v17 = vpack.c.bf16 (!%p113_p6), %v681_v14, %v677_v12  ;;  %v750_v18 = vpack.c.bf16 (!%p113_p6), %v683_v16, %v679_v15  ;;  %v676_v19 = vld [vmem:[%s1189_s1 + $0x160] sm:$0xff] (!%p113_p6)  ;;  %v678_v21 = vld [vmem:[%s1189_s1 + $0x170] sm:$0xff] (!%p113_p6)  ;;  %v685_v24 = vld [vmem:[%s1189_s1 + $0x1a8] sm:$0xff] (!%p113_p6) }
   0xf   : > { %733 = vmatpush1.bf16.msra.mxu0 (!%p113_p6), %v732_v9  ;;  %v680_v20 = vld [vmem:[%s1189_s1 + $0x180] sm:$0xff] (!%p113_p6)  ;;  %v682_v23 = vld [vmem:[%s1189_s1 + $0x190] sm:$0xff] (!%p113_p6)  ;;  %v689_v25 = vld [vmem:[%s1189_s1 + $0x1c8] sm:$0xff] (!%p113_p6) }
  0x10   : > { %749 = vmatpush1.bf16.msra.mxu1 (!%p113_p6), %v748_v13  ;;  %v736_v22 = vpack.c.bf16 (!%p113_p6), %v680_v20, %v676_v19  ;;  %735 = vmatprep.subr.bf16.mxu0 (!%p113_p6), %v734_v17  ;;  %v752_v26 = vpack.c.bf16 (!%p113_p6), %v682_v23, %v678_v21  ;;  %v738_v27 = vpack.c.bf16 (!%p113_p6), %v689_v25, %v685_v24  ;;  %v687_v28 = vld [vmem:[%s1189_s1 + $0x1b8] sm:$0xff] (!%p113_p6)  ;;  %v684_v30 = vld [vmem:[%s1189_s1 + $0x1a0] sm:$0xff] (!%p113_p6)  ;;  %v686_v33 = vld [vmem:[%s1189_s1 + $0x1b0] sm:$0xff] (!%p113_p6) }
  0x11   : > { %751 = vmatprep.subr.bf16.mxu1 (!%p113_p6), %v750_v18  ;;  %v691_v29 = vld [vmem:[%s1189_s1 + $0x1d8] sm:$0xff] (!%p113_p6)  ;;  %v688_v32 = vld [vmem:[%s1189_s1 + $0x1c0] sm:$0xff] (!%p113_p6)  ;;  %v690_v34 = vld [vmem:[%s1189_s1 + $0x1d0] sm:$0xff] (!%p113_p6) }
  0x12   : > { %v754_v31 = vpack.c.bf16 %v691_v29, %v687_v28  ;;  %v740_v35 = vpack.c.bf16 %v688_v32, %v684_v30  ;;  %v693_v36 = vld [vmem:[%s1189_s1 + $0x1e8] sm:$0xff]  ;;  %v695_v38 = vld [vmem:[%s1189_s1 + $0x1f8] sm:$0xff]  ;;  %s984_s28 = scalar_select %p133_p7, %s881_s12, 1  ;;  %v756_v39 = vpack.c.bf16 %v690_v34, %v686_v33  ;;  %v692_v42 = vld [vmem:[%s1189_s1 + $0x1e0] sm:$0xff] }
  0x13   : > { %737 = vmatpush1.bf16.msra.mxu0 %v736_v22  ;;  %v697_v37 = vld [vmem:[%s1189_s1 + $0x208] sm:$0xff]  ;;  %v699_v41 = vld [vmem:[%s1189_s1 + $0x218] sm:$0xff]  ;;  %v696_v43 = vld [vmem:[%s1189_s1 + $0x200] sm:$0xff]  ;;  %s729_s9 = sshll.u32 (%p893_p4), %s881_s12, 5 }
  0x14   : > { %753 = vmatpush1.bf16.msra.mxu1 %v752_v26  ;;  %739 = vmatprep.subr.bf16.mxu0 %v738_v27  ;;  %v742_v40 = vpack.c.bf16 %v697_v37, %v693_v36  ;;  %v758_v44 = vpack.c.bf16 %v699_v41, %v695_v38  ;;  %v694_v45 = vld [vmem:[%s1189_s1 + $0x1f0] sm:$0xff]  ;;  %v744_v47 = vpack.c.bf16 %v696_v43, %v692_v42  ;;  %s802_s15 = smul.u32 24, %s984_s28  ;;  %v701_v49 = vld [vmem:[%s1189_s1 + $0x228] sm:$0xf]  ;;  %v703_v50 = vld [vmem:[%s1189_s1 + $0x238] sm:$0xf] }
  0x15   : > { %755 = vmatprep.subr.bf16.mxu1 %v754_v31  ;;  %v698_v46 = vld [vmem:[%s1189_s1 + $0x210] sm:$0xff]  ;;  %v143_v51 = vld [vmem:[%s1189_s1 + $0x8] sm:$0xff]  ;;  %v700_v53 = vld [vmem:[%s1189_s1 + $0x220] sm:$0xf] }
  0x16   : > { %v760_v48 = vpack.c.bf16 %v698_v46, %v694_v45  ;;  %v147_v52 = vld [vmem:[%s1189_s1 + $0x28] sm:$0xff]  ;;  %v145_v54 = vld [vmem:[%s1189_s1 + $0x18] sm:$0xff]  ;;  %s1026_s6 = scalar_lea.vmem %s1188_s0, %s802_s15  ;;  %v142_v56 = vld [vmem:[%s1189_s1] sm:$0xff]  ;;  %s579_s15 = scalar_lea.vmem (%p893_p4), %s1190_s2, %s729_s9 }
  0x17   : > { %741 = vmatpush1.bf16.msra.mxu0 %v740_v35  ;;  %v149_v55 = vld [vmem:[%s1189_s1 + $0x38] sm:$0xff]  ;;  %v146_v57 = vld [vmem:[%s1189_s1 + $0x20] sm:$0xff]  ;;  %v144_v58 = vld [vmem:[%s1189_s1 + $0x10] sm:$0xff]  ;;  %v762_v59 = vpack.c.bf16 %v147_v52, %v143_v51 }
  0x18   : > { %757 = vmatpush1.bf16.msra.mxu1 %v756_v39  ;;  %743 = vmatprep.subr.bf16.mxu0 %v742_v40  ;;  %v148_v60 = vld [vmem:[%s1189_s1 + $0x30] sm:$0xff]  ;;  %v151_v61 = vld [vmem:[%s1189_s1 + $0x48] sm:$0xff]  ;;  %v778_v0 = vpack.c.bf16 %v149_v55, %v145_v54  ;;  %v153_v1 = vld [vmem:[%s1189_s1 + $0x58] sm:$0xff]  ;;  %v764_v4 = vpack.c.bf16 %v146_v57, %v142_v56 }
  0x19   : > { %759 = vmatprep.subr.bf16.mxu1 %v758_v44  ;;  %v155_v62 = vld [vmem:[%s1189_s1 + $0x68] sm:$0xff]  ;;  %v702_v63 = vld [vmem:[%s1189_s1 + $0x230] sm:$0xf]  ;;  %v157_v2 = vld [vmem:[%s1189_s1 + $0x78] sm:$0xff]  ;;  %v780_v5 = vpack.c.bf16 %v148_v60, %v144_v58 }
  0x1a   : > { %v140_v3 = vld [vmem:[%s1026_s6 + $0x1] sm:$0xff]  ;;  %v766_v6 = vpack.c.bf16 %v155_v62, %v151_v61  ;;  %v152_v10 = vld [vmem:[%s1189_s1 + $0x50] sm:$0xff]  ;;  %v782_v11 = vpack.c.bf16 %v157_v2, %v153_v1  ;;  %v161_v15 = vld [vmem:[%s1189_s1 + $0x98] sm:$0xff] }
  0x1b   : > { %745 = vmatpush1.bf16.msra.mxu0 %v744_v47  ;;  %v150_v8 = vld [vmem:[%s1189_s1 + $0x40] sm:$0xff]  ;;  %v156_v12 = vld [vmem:[%s1189_s1 + $0x70] sm:$0xff]  ;;  %v159_v13 = vld [vmem:[%s1189_s1 + $0x88] sm:$0xff] }
  0x1c   : > { %761 = vmatpush1.bf16.msra.mxu1 %v760_v48  ;;  %704 = vmatprep.subr.msk.mxu0 %vm222_vm0, %v701_v49  ;;  %v154_v9 = vld [vmem:[%s1189_s1 + $0x60] sm:$0xff]  ;;  %v163_v14 = vld [vmem:[%s1189_s1 + $0xa8] sm:$0xff]  ;;  %v165_v16 = vld [vmem:[%s1189_s1 + $0xb8] sm:$0xff]  ;;  %v784_v19 = vpack.c.bf16 %v156_v12, %v152_v10 }
  0x1d   : > { %708 = vmatprep.subr.msk.mxu1 %vm222_vm0, %v703_v50  ;;  %v768_v17 = vpack.c.bf16 %v154_v9, %v150_v8  ;;  %v141_v18 = vld [vmem:[%s1026_s6 + $0x9] sm:$0xff]  ;;  %v770_v20 = vpack.c.bf16 %v163_v14, %v159_v13  ;;  %v158_v21 = vld [vmem:[%s1189_s1 + $0x80] sm:$0xff]  ;;  %v786_v24 = vpack.c.bf16 %v165_v16, %v161_v15  ;;  %v169_v28 = vld [vmem:[%s1189_s1 + $0xd8] sm:$0xff] }
  0x1e   : > { %v162_v22 = vld [vmem:[%s1189_s1 + $0xa0] sm:$0xff]  ;;  %v160_v23 = vld [vmem:[%s1189_s1 + $0x90] sm:$0xff]  ;;  %v167_v26 = vld [vmem:[%s1189_s1 + $0xc8] sm:$0xff] }
  0x1f   : > { %705 = vmatpush1.msk.msra.mxu0 %vm222_vm0, %v700_v53  ;;  %v164_v25 = vld [vmem:[%s1189_s1 + $0xb0] sm:$0xff]  ;;  %v171_v27 = vld [vmem:[%s1189_s1 + $0xe8] sm:$0xff]  ;;  %v173_v29 = vld [vmem:[%s1189_s1 + $0xf8] sm:$0xff]  ;;  %v772_v30 = vpack.c.bf16 %v162_v22, %v158_v21 }
  0x20   : > { %709 = vmatpush1.msk.msra.mxu1 %vm222_vm0, %v702_v63  ;;  %763 = vmatprep.subr.bf16.mxu0 %v762_v59  ;;  %v788_v31 = vpack.c.bf16 %v164_v25, %v160_v23  ;;  %v774_v32 = vpack.c.bf16 %v171_v27, %v167_v26  ;;  %v166_v33 = vld [vmem:[%s1189_s1 + $0xc0] sm:$0xff]  ;;  %v790_v35 = vpack.c.bf16 %v173_v29, %v169_v28  ;;  %v168_v36 = vld [vmem:[%s1189_s1 + $0xd0] sm:$0xff]  ;;  %v175_v40 = vld [vmem:[%s1189_s1 + $0x108] sm:$0xf] }
  0x21   : > { %779 = vmatprep.subr.bf16.mxu1 %v778_v0  ;;  %706 = vmatmul.mubr.msk.f32.vlgmr.msra.gmra.mrb[0].mxu0 %vm215_vm1, %v140_v3  ;;  %v170_v34 = vld [vmem:[%s1189_s1 + $0xe0] sm:$0xff]  ;;  %v172_v37 = vld [vmem:[%s1189_s1 + $0xf0] sm:$0xff]  ;;  %v177_v41 = vld [vmem:[%s1189_s1 + $0x118] sm:$0xf] }
  0x22   : > { %710 = vmatmul.mubr.msk.f32.vlgmr.msra.gmra.mrb[0].mxu1 %vm215_vm1, %v140_v3  ;;  %765 = vmatpush1.bf16.msra.mxu0 %v764_v4  ;;  %v776_v38 = vpack.c.bf16 %v170_v34, %v166_v33  ;;  %v792_v39 = vpack.c.bf16 %v172_v37, %v168_v36  ;;  %v174_v42 = vld [vmem:[%s1189_s1 + $0x100] sm:$0xf]  ;;  %v176_v43 = vld [vmem:[%s1189_s1 + $0x110] sm:$0xf]  ;;  %v139_v45 = vld [vmem:[%s1026_s6 + $0x8] sm:$0xff] }
  0x23   : > { %781 = vmatpush1.bf16.msra.mxu1 %v780_v5  ;;  %767 = vmatprep.subr.bf16.mxu0 %v766_v6  ;;  %v138_v44 = vld [vmem:[%s1026_s6] sm:$0xff] }
  0x24   : > { %783 = vmatprep.subr.bf16.mxu1 %v782_v11  ;;  %305 = vmatprep.mubr.f32.mxu0 %v852_v7 }
  0x25   : > { %382 = vmatprep.mubr.f32.mxu1 %v852_v7  ;;  %707 = vmatmul.mubr.msk.f32.gmra.mrb[2].mxu0 %vm215_vm1, %v141_v18 }
  0x26   : > { %769 = vmatpush1.bf16.msra.mxu0 %v768_v17  ;;  %711 = vmatmul.mubr.msk.f32.gmra.mrb[2].mxu1 %vm215_vm1, %v141_v18 }
  0x27   : > { %785 = vmatpush1.bf16.msra.mxu1 %v784_v19  ;;  %771 = vmatprep.subr.bf16.mxu0 %v770_v20 }
  0x28   : > { %787 = vmatprep.subr.bf16.mxu1 %v786_v24  ;;  %471 = vmatprep.mubr.f32.mxu0 %v852_v7 }
  0x29   : > { %548 = vmatprep.mubr.f32.mxu1 %v852_v7 }
  0x2a   : > { %773 = vmatpush1.bf16.msra.mxu0 %v772_v30 }
  0x2b   : > { %789 = vmatpush1.bf16.msra.mxu1 %v788_v31  ;;  %775 = vmatprep.subr.bf16.mxu0 %v774_v32 }
  0x2c   : > { %791 = vmatprep.subr.bf16.mxu1 %v790_v35 }
  0x2e   : > { %777 = vmatpush1.bf16.msra.mxu0 %v776_v38 }
  0x2f   : > { %793 = vmatpush1.bf16.msra.mxu1 %v792_v39  ;;  %712 = vmatprep.subr.msk.mxu0 %vm222_vm0, %v175_v40 }
  0x30   : > { %716 = vmatprep.subr.msk.mxu1 %vm222_vm0, %v177_v41 }
  0x32   : > { %713 = vmatpush1.msk.msra.mxu0 %vm222_vm0, %v174_v42 }
  0x33   : > { %717 = vmatpush1.msk.msra.mxu1 %vm222_vm0, %v176_v43  ;;  %714 = vmatmul.mubr.msk.f32.vlgmr.msra.gmra.mrb[0].mxu0 %vm215_vm1, %v138_v44 }
  0x34   : > { %718 = vmatmul.mubr.msk.f32.vlgmr.msra.gmra.mrb[0].mxu1 %vm215_vm1, %v138_v44  ;;  %477 = vmatprep.mubr.f32.mxu0 %v852_v7 }
  0x35   : > { %554 = vmatprep.mubr.f32.mxu1 %v852_v7 }
  0x37   : > { %715 = vmatmul.mubr.msk.f32.gmra.mrb[2].mxu0 %vm215_vm1, %v139_v45 }
  0x38   : > { %719 = vmatmul.mubr.msk.f32.gmra.mrb[2].mxu1 %vm215_vm1, %v139_v45 }
 0x106   : > { %v473_v46 = vpop.f32.mrb[0].mxu0 }
 0x107   : > { %561 = vst [vmem:[%s1154_s19] sm:$0xff] %v473_v46  ;;  %v550_v47 = vpop.f32.mrb[0].mxu1  ;;  %v475_v7 = vpop.f32.mrb[1].mxu0  ;;  %576 = sbr.rel (!%p893_p4) target bundleno = 278 (0x116), region = 32 }
 0x108   : > { %720 = vst [vmem:[%s1154_s19 + $0x20] sm:$0xff] %v550_v47  ;;  %562 = vst [vmem:[%s1154_s19 + $0x8] sm:$0xff] %v475_v7  ;;  %v552_v48 = vpop.f32.mrb[1].mxu1 }
 0x109   : > { %721 = vst [vmem:[%s1154_s19 + $0x28] sm:$0xff] %v552_v48 }
 0x10a   : > { %v479_v49 = vpop.f32.mrb[2].mxu0 }
 0x10b   : > { %563 = vst [vmem:[%s1154_s19 + $0x10] sm:$0xff] %v479_v49  ;;  %v556_v50 = vpop.f32.mrb[2].mxu1  ;;  %v481_v51 = vpop.f32.mrb[3].mxu0 }
 0x10c   : > { %722 = vst [vmem:[%s1154_s19 + $0x30] sm:$0xff] %v556_v50  ;;  %564 = vst [vmem:[%s1154_s19 + $0x18] sm:$0xff] %v481_v51  ;;  %v558_v52 = vpop.f32.mrb[3].mxu1 }
 0x10d   : > { %723 = vst [vmem:[%s1154_s19 + $0x38] sm:$0xff] %v558_v52 }
 0x10e   : > { %v592_v53 = vld [vmem:[%s1154_s19] sm:$0xff] }
 0x10f   : > { %v594_v54 = vld [vmem:[%s1154_s19 + $0x8] sm:$0xff]  ;;  %v600_v57 = vld [vmem:[%s1154_s19 + $0x20] sm:$0xff]  ;;  %593 = vst [vmem:[%s579_s15] sm:$0xff] %v592_v53 }
 0x110   : > { %v602_v58 = vld [vmem:[%s1154_s19 + $0x28] sm:$0xff]  ;;  %595 = vst [vmem:[%s579_s15 + $0x8] sm:$0xff] %v594_v54  ;;  %601 = vst [vmem:[%s579_s15 + $0x40] sm:$0xff] %v600_v57 }
 0x111   : > { %603 = vst [vmem:[%s579_s15 + $0x48] sm:$0xff] %v602_v58 }
 0x112   : > { %v596_v55 = vld [vmem:[%s1154_s19 + $0x10] sm:$0xff] }
 0x113   : > { %v598_v56 = vld [vmem:[%s1154_s19 + $0x18] sm:$0xff]  ;;  %597 = vst [vmem:[%s579_s15 + $0x10] sm:$0xff] %v596_v55  ;;  %v604_v59 = vld [vmem:[%s1154_s19 + $0x30] sm:$0xff] }
 0x114   : > { %599 = vst [vmem:[%s579_s15 + $0x18] sm:$0xff] %v598_v56  ;;  %v606_v60 = vld [vmem:[%s1154_s19 + $0x38] sm:$0xff]  ;;  %605 = vst [vmem:[%s579_s15 + $0x50] sm:$0xff] %v604_v59 }
 0x115   : > { %607 = vst [vmem:[%s579_s15 + $0x58] sm:$0xff] %v606_v60 }
 0x116 PF: > { %p9_p8 = scmp.ge.s32.totalorder %s883_s13, 4   ;;  %s1192_s9 = smov %s846_s10 }
 0x117   : > { %s1193_s10 = smov %s891_s16  ;;  %s1194_s11 = smov %s883_s13 }
 0x118   :  { %11 = sbr.rel (!%p9_p8) target bundleno = 2 (0x2), region = 83 }

</bundles_post_ra>
